<compile_context>
chip_gen: v7x
topology: tpu7x:2x2x1
jax: 0.10.0
libtpu: 0.0.40
codegen_flags: <defaults>
</compile_context>

<pallas_src>
import functools

import jax
import jax.numpy as jnp
import numpy as np
from jax.experimental import pallas as pl
from jax.experimental.pallas import tpu as pltpu


def _round_up(n, m):
    return ((n + m - 1) // m) * m


def mlp_kernel(x_ref, w1t_ref, b1_ref, w2_ref, b2_ref, o_ref, acc_ref, *, row_chunk):
    """One (batch tile, hidden tile) step of the fused MLP forward.

    x_ref  : (b_tile, Kp)      VMEM bf16  input activations (zero-padded K)
    w1t_ref: (Kp, np_tile)     VMEM bf16  fc1 weight (transposed), hidden-tile slice
    b1_ref : (1, np_tile)      VMEM f32   fc1 bias slice (zero-padded)
    w2_ref : (1, np_tile)      VMEM f32   fc2 weight row slice (zero-padded)
    b2_ref : (1,)              SMEM f32   fc2 bias scalar
    o_ref  : (1, b_tile)       VMEM f32   lane-dense sigmoid output (leading grid dim squeezed)
    acc_ref: (1, b_tile)       VMEM f32   fc2 partial-sum accumulator across hidden tiles
    """
    j = pl.program_id(1)

    @pl.when(j == 0)
    def _init():
        acc_ref[...] = jnp.zeros_like(acc_ref)

    w1t = w1t_ref[...]
    b1 = b1_ref[...]
    w2 = w2_ref[...]

    b_tile = x_ref.shape[0]
    n_chunks = b_tile // row_chunk
    # Chunk the fc1 matmul + epilogue over rows so the live f32 h tile stays small
    # (row_chunk x np_tile) instead of materializing (b_tile x np_tile) at once.
    for c in range(n_chunks):
        r0 = c * row_chunk
        h = jnp.dot(x_ref[pl.ds(r0, row_chunk), :], w1t,
                    preferred_element_type=jnp.float32)          # MXU, f32 accumulation
        h = jnp.maximum(h + b1, 0.0)                              # bias + ReLU (VPU)
        # TODO(synk): nn.Dropout(p=0.2) is identity in eval/inference; training-mode RNG
        # mask intentionally omitted.
        part = jnp.sum(h * w2, axis=-1)                           # VPU mul + XLU lane reduce
        acc_ref[:, pl.ds(r0, row_chunk)] += part[None, :]

    @pl.when(j == pl.num_programs(1) - 1)
    def _finalize():
        o = acc_ref[...] + b2_ref[0]                              # (1, b_tile) logits
        # exp and approximate reciprocal both go to the EUP slot (VALU stays free).
        o_ref[...] = pl.reciprocal(1.0 + jnp.exp(-o), approx=True)


def mlp_forward(x, params, *, b_tile=None, np_tile=None):
    """x: (B, 2*EMB_DIM) float32 -> (B, 1) float32 (matches torch MLP.forward, eval mode)."""
    w1, b1, w2, b2 = params            # torch shapes: (E, 2E), (E,), (1, E), (1,)
    B, K = x.shape
    E = w1.shape[0]
    assert w1.shape == (E, K) and b1.shape == (E,) and w2.shape == (1, E) and b2.shape == (1,)

    Kp = _round_up(K, 128)             # contraction dim -> clean 128-lane MXU tiles

    # Per-generation VMEM capacity (v7x: 64 MiB/TC, v5e/v6e: 128 MiB); leave headroom.
    try:
        vmem_cap = int(getattr(pltpu.get_tpu_info(), "vmem_capacity_bytes", 64 << 20))
    except Exception:  # pragma: no cover - conservative fallback
        vmem_cap = 64 << 20
    vmem_budget = min(int(vmem_cap * 0.8), vmem_cap - (8 << 20))

    # Hidden-dim tile: stream W1^T in <=512-wide column blocks (accumulated over the
    # "arbitrary" grid axis) instead of requiring the whole weight to be VMEM-resident.
    if np_tile is None:
        np_tile = min(512, _round_up(E, 128))
    np_tile = _round_up(min(np_tile, _round_up(E, 128)), 128)

    # Batch tile: multiple of 8; default gives >=2 tiles so both v7x TCs get work under
    # dimension_semantics=("parallel", ...); bigger cap when VMEM is roomy (v5e/v6e).
    b_cap = 1024 if vmem_cap >= (96 << 20) else 512
    if b_tile is None:
        b_tile = min(b_cap, _round_up(pl.cdiv(B, 2), 8), _round_up(B, 8))
    b_tile = _round_up(min(b_tile, _round_up(B, 8)), 8)

    def _row_chunk(bt):
        return 128 if (bt > 128 and bt % 128 == 0) else bt

    def _needed(bt, nt):
        rc = _row_chunk(bt)
        return (2 * bt * Kp * 2            # x tile, double-buffered, bf16
                + 2 * Kp * nt * 2          # W1^T block, double-buffered (pipeline default), bf16
                + 2 * 2 * nt * 4           # b1 + w2 blocks, double-buffered, f32
                + 2 * bt * 4               # output block, double-buffered, f32
                + bt * 4                   # accumulator scratch
                + rc * nt * 4              # live h chunk
                + (4 << 20))               # compiler / internal scratch headroom

    # Shrink tiles until the (double-buffer-aware) footprint fits, instead of clamping.
    while _needed(b_tile, np_tile) > vmem_budget and np_tile > 128:
        np_tile = max(128, _round_up(np_tile // 2, 128))
    while _needed(b_tile, np_tile) > vmem_budget and b_tile > 8:
        b_tile = max(8, _round_up(b_tile // 2, 8))
    # (For extreme Kp a K-tiling axis would be the next step; not needed for this module.)

    Np = _round_up(E, np_tile)         # hidden dim padded to a whole number of np_tiles
    Bp = _round_up(B, b_tile)
    n_b = Bp // b_tile
    n_j = Np // np_tile
    row_chunk = _row_chunk(b_tile)
    vmem_limit = int(min(max(_needed(b_tile, np_tile), 32 << 20), vmem_budget))

    # Weights / biases, zero-padded (exact: relu(0)=0 and padded w2 lanes are 0).
    w1t = jnp.zeros((Kp, Np), jnp.bfloat16).at[:K, :E].set(w1.astype(jnp.bfloat16).T)
    b1p = jnp.zeros((1, Np), jnp.float32).at[:, :E].set(b1.astype(jnp.float32)[None, :])
    w2p = jnp.zeros((1, Np), jnp.float32).at[:, :E].set(w2.astype(jnp.float32))
    b2p = b2.astype(jnp.float32).reshape(1)

    # Single half-width copy: the bf16 cast is needed anyway; fuse the zero pad into it and
    # only pad when K/B genuinely need it. K padding must stay explicit zeros.
    x_bf = x.astype(jnp.bfloat16)
    if Bp != B or Kp != K:
        x_bf = jnp.pad(x_bf, ((0, Bp - B), (0, Kp - K)))

    cost = pl.CostEstimate(
        flops=2 * Bp * Kp * Np + 3 * Bp * Np,
        transcendentals=2 * Bp,
        bytes_accessed=Bp * Kp * 2 + n_b * Kp * Np * 2 + 2 * Np * 4 + Bp * 4,
    )

    out = pl.pallas_call(
        functools.partial(mlp_kernel, row_chunk=row_chunk),
        out_shape=jax.ShapeDtypeStruct((n_b, 1, b_tile), jnp.float32),
        grid=(n_b, n_j),
        in_specs=[
            pl.BlockSpec((b_tile, Kp), lambda i, j: (i, 0)),        # x: pipelined over batch
            pl.BlockSpec((Kp, np_tile), lambda i, j: (0, j)),       # W1^T: streamed over hidden
            pl.BlockSpec((1, np_tile), lambda i, j: (0, j)),        # fc1 bias slice
            pl.BlockSpec((1, np_tile), lambda i, j: (0, j)),        # fc2 weight row slice
            pl.BlockSpec(memory_space=pltpu.MemorySpace.SMEM),      # fc2 bias scalar
        ],
        out_specs=pl.BlockSpec((None, 1, b_tile), lambda i, j: (i, 0, 0)),  # lane-dense store
        scratch_shapes=[pltpu.VMEM((1, b_tile), jnp.float32)],      # fc2 partial-sum accumulator
        compiler_params=pltpu.CompilerParams(
            dimension_semantics=("parallel", "arbitrary"),          # batch sharded across TCs
            vmem_limit_bytes=vmem_limit,
        ),
        cost_estimate=cost,
    )(x_bf, w1t, b1p, w2p, b2p)

    return out.reshape(-1)[:B].reshape(B, 1)


def init_params(key, emb_dim):
    """Deterministic init mirroring nn.Linear (uniform +/- 1/sqrt(fan_in))."""
    ks = jax.random.split(key, 4)
    u = lambda k, shape, fan: jax.random.uniform(
        k, shape, jnp.float32, -1.0 / np.sqrt(fan), 1.0 / np.sqrt(fan))
    w1 = u(ks[0], (emb_dim, 2 * emb_dim), 2 * emb_dim)
    b1 = u(ks[1], (emb_dim,), 2 * emb_dim)
    w2 = u(ks[2], (1, emb_dim), emb_dim)
    b2 = u(ks[3], (1,), emb_dim)
    return w1, b1, w2, b2


def mlp_reference(x, params):
    """Pure-JAX f32 reference with the module's (inference) semantics."""
    w1, b1, w2, b2 = params
    h = jnp.maximum(x @ w1.T + b1, 0.0)
    o = h @ w2.T + b2
    return 1.0 / (1.0 + jnp.exp(-o))


def mlp_reference_bf16(x, params):
    """Reference with bf16-rounded matmul inputs (matches the kernel's MXU dtype)."""
    w1, b1, w2, b2 = params
    xb = x.astype(jnp.bfloat16).astype(jnp.float32)
    w1b = w1.astype(jnp.bfloat16).astype(jnp.float32)
    h = jnp.maximum(xb @ w1b.T + b1, 0.0)
    o = h @ w2.T + b2
    return 1.0 / (1.0 + jnp.exp(-o))


if __name__ == "__main__":
    key = jax.random.PRNGKey(0)

    configs = [
        # (EMB_DIM, B, b_tile, np_tile)
        (40, 48, 16, None),     # K=80 -> lane pad; 3 pipelined batch tiles, single hidden tile
        (136, 50, None, 128),   # ragged batch (zero-pad path) + 2 hidden tiles (accumulator path)
        (64, 300, 256, None),   # b_tile=256 -> chunked (128-row) fc1 epilogue path
    ]

    for emb_dim, batch, bt, nt in configs:
        kx, kp, key = jax.random.split(key, 3)
        x = jax.random.normal(kx, (batch, 2 * emb_dim), dtype=jnp.float32)
        params = init_params(kp, emb_dim)

        out = jax.block_until_ready(mlp_forward(x, params, b_tile=bt, np_tile=nt))
        assert out.shape == (batch, 1), out.shape

        ref_bf = jax.block_until_ready(mlp_reference_bf16(x, params))
        ref_f32 = jax.block_until_ready(mlp_reference(x, params))
        np.testing.assert_allclose(np.asarray(out), np.asarray(ref_bf), rtol=5e-3, atol=5e-3)
        np.testing.assert_allclose(np.asarray(out), np.asarray(ref_f32), rtol=2.5e-2, atol=2.5e-2)

    print("KERNEL_OK")
</pallas_src>

<mosaic_0001>
module attributes {stable_mosaic.version = 11 : i64} {
  func.func @mlp_kernel(%arg0: i32, %arg1: i32, %arg2: memref<16x128xbf16, #tpu.memory_space<vmem>>, %arg3: memref<128x128xbf16, #tpu.memory_space<vmem>>, %arg4: memref<1x128xf32, #tpu.memory_space<vmem>>, %arg5: memref<1x128xf32, #tpu.memory_space<vmem>>, %arg6: memref<1xf32, #tpu.memory_space<smem>>, %arg7: memref<1x1x16xf32, #tpu.memory_space<vmem>>, %arg8: memref<1x16xf32, #tpu.memory_space<vmem>>) attributes {dimension_semantics = [#tpu.dimension_semantics<parallel>, #tpu.dimension_semantics<arbitrary>], iteration_bounds = array<i64: 3, 1>, scalar_prefetch = 0 : i64, scratch_operands = 1 : i64, tpu.core_type = #tpu.core_type<tc>, window_params = [{transform_indices = @transform_0, window_bounds = array<i64: 16, 128>}, {transform_indices = @transform_1, window_bounds = array<i64: 128, 128>}, {transform_indices = @transform_2, window_bounds = array<i64: 1, 128>}, {transform_indices = @transform_3, window_bounds = array<i64: 1, 128>}, {transform_indices = @transform_4, window_bounds = array<i64: 1>}, {transform_indices = @transform_5, window_bounds = array<i64: 1, 1, 16>}]} {
    %c0_i32 = arith.constant 0 : i32
    %0 = arith.cmpi eq, %arg1, %c0_i32 : i32
    %1 = arith.extui %0 : i1 to i32
    %c0_i32_0 = arith.constant 0 : i32
    %2 = arith.cmpi ne, %1, %c0_i32_0 : i32
    scf.if %2 {
      %cst_16 = arith.constant 0.000000e+00 : f32
      %22 = vector.broadcast %cst_16 : f32 to vector<1x16xf32>
      %c0_17 = arith.constant 0 : index
      %c0_18 = arith.constant 0 : index
      %23 = vector.load %arg8[%c0_17, %c0_18] : memref<1x16xf32, #tpu.memory_space<vmem>>, vector<1x16xf32>
      tpu.vector_store %arg8[%c0_17, %c0_18], %22 {strides = array<i32>} : memref<1x16xf32, #tpu.memory_space<vmem>>, vector<1x16xf32>,
    } else {
    }
    %c0 = arith.constant 0 : index
    %c0_1 = arith.constant 0 : index
    %3 = vector.load %arg3[%c0, %c0_1] : memref<128x128xbf16, #tpu.memory_space<vmem>>, vector<128x128xbf16>
    %c0_2 = arith.constant 0 : index
    %c0_3 = arith.constant 0 : index
    %4 = vector.load %arg4[%c0_2, %c0_3] : memref<1x128xf32, #tpu.memory_space<vmem>>, vector<1x128xf32>
    %c0_4 = arith.constant 0 : index
    %c0_5 = arith.constant 0 : index
    %5 = vector.load %arg5[%c0_4, %c0_5] : memref<1x128xf32, #tpu.memory_space<vmem>>, vector<1x128xf32>
    %c0_6 = arith.constant 0 : index
    %c0_7 = arith.constant 0 : index
    %6 = vector.load %arg2[%c0_6, %c0_7] : memref<16x128xbf16, #tpu.memory_space<vmem>>, vector<16x128xbf16>
    %cst = arith.constant dense<0.000000e+00> : vector<16x128xf32>
    %7 = tpu.matmul %6, %3, %cst {dimension_numbers = #tpu.dot_dimension_numbers<[1], [0], [0], [1], [0, 0, 1, 1], [], []>} : vector<16x128xbf16>, vector<128x128xbf16>, vector<16x128xf32> -> vector<16x128xf32>
    %8 = vector.broadcast %4 : vector<1x128xf32> to vector<16x128xf32>
    %9 = arith.addf %7, %8 : vector<16x128xf32>
    %cst_8 = arith.constant 0.000000e+00 : f32
    %10 = vector.broadcast %cst_8 : f32 to vector<16x128xf32>
    %11 = arith.maximumf %9, %10 : vector<16x128xf32>
    %12 = vector.broadcast %5 : vector<1x128xf32> to vector<16x128xf32>
    %13 = arith.mulf %11, %12 : vector<16x128xf32>
    %cst_9 = arith.constant dense<0.000000e+00> : vector<16xf32>
    %14 = vector.multi_reduction <add>, %13, %cst_9 [1] : vector<16x128xf32> to vector<16xf32>
    %c0_10 = arith.constant 0 : index
    %c0_11 = arith.constant 0 : index
    %15 = vector.load %arg8[%c0_10, %c0_11] : memref<1x16xf32, #tpu.memory_space<vmem>>, vector<1x16xf32>
    %16 = vector.shape_cast %14 : vector<16xf32> to vector<1x16xf32>
    %17 = arith.addf %15, %16 : vector<1x16xf32>
    %c0_12 = arith.constant 0 : index
    %c0_13 = arith.constant 0 : index
    %18 = vector.load %arg8[%c0_12, %c0_13] : memref<1x16xf32, #tpu.memory_space<vmem>>, vector<1x16xf32>
    tpu.vector_store %arg8[%c0_12, %c0_13], %17 {strides = array<i32>} : memref<1x16xf32, #tpu.memory_space<vmem>>, vector<1x16xf32>,
    %c0_i32_14 = arith.constant 0 : i32
    %19 = arith.cmpi eq, %arg1, %c0_i32_14 : i32
    %20 = arith.extui %19 : i1 to i32
    %c0_i32_15 = arith.constant 0 : i32
    %21 = arith.cmpi ne, %20, %c0_i32_15 : i32
    scf.if %21 {
      %c0_16 = arith.constant 0 : index
      %c0_17 = arith.constant 0 : index
      %22 = vector.load %arg8[%c0_16, %c0_17] : memref<1x16xf32, #tpu.memory_space<vmem>>, vector<1x16xf32>
      %c0_18 = arith.constant 0 : index
      %23 = memref.load %arg6[%c0_18] : memref<1xf32, #tpu.memory_space<smem>>
      %24 = vector.broadcast %23 : f32 to vector<1x16xf32>
      %25 = arith.addf %22, %24 : vector<1x16xf32>
      %cst_19 = arith.constant 0.000000e+00 : f32
      %26 = vector.broadcast %cst_19 : f32 to vector<1x16xf32>
      %27 = arith.subf %26, %25 : vector<1x16xf32>
      %28 = math.exp %27 : vector<1x16xf32>
      %cst_20 = arith.constant 1.000000e+00 : f32
      %29 = vector.broadcast %cst_20 : f32 to vector<1x16xf32>
      %30 = arith.addf %29, %28 : vector<1x16xf32>
      %31 = tpu.reciprocal %30 {approx = true} : vector<1x16xf32> -> vector<1x16xf32>
      %c0_21 = arith.constant 0 : index
      %c0_22 = arith.constant 0 : index
      %c0_23 = arith.constant 0 : index
      %32 = vector.load %arg7[%c0_21, %c0_22, %c0_23] : memref<1x1x16xf32, #tpu.memory_space<vmem>>, vector<1x1x16xf32>
      %33 = vector.shape_cast %32 : vector<1x1x16xf32> to vector<1x16xf32>
      %34 = vector.shape_cast %31 : vector<1x16xf32> to vector<1x1x16xf32>
      tpu.vector_store %arg7[%c0_21, %c0_22, %c0_23], %34 {strides = array<i32>} : memref<1x1x16xf32, #tpu.memory_space<vmem>>, vector<1x1x16xf32>,
    } else {
    }
    return
  }
  func.func @transform_0(%arg0: i32, %arg1: i32) -> (i32, i32) {
    %c0_i32 = arith.constant 0 : i32
    %c0_i32_0 = arith.constant 0 : i32
    return %arg0, %c0_i32 : i32, i32
  }
  func.func @transform_1(%arg0: i32, %arg1: i32) -> (i32, i32) {
    %c0_i32 = arith.constant 0 : i32
    %c0_i32_0 = arith.constant 0 : i32
    return %c0_i32, %arg1 : i32, i32
  }
  func.func @transform_2(%arg0: i32, %arg1: i32) -> (i32, i32) {
    %c0_i32 = arith.constant 0 : i32
    %c0_i32_0 = arith.constant 0 : i32
    return %c0_i32, %arg1 : i32, i32
  }
  func.func @transform_3(%arg0: i32, %arg1: i32) -> (i32, i32) {
    %c0_i32 = arith.constant 0 : i32
    %c0_i32_0 = arith.constant 0 : i32
    return %c0_i32, %arg1 : i32, i32
  }
  func.func @transform_4(%arg0: i32, %arg1: i32) -> i32 {
    %c0_i32 = arith.constant 0 : i32
    %c0_i32_0 = arith.constant 0 : i32
    return %c0_i32 : i32
  }
  func.func @transform_5(%arg0: i32, %arg1: i32) -> (i32, i32, i32) {
    %c0_i32 = arith.constant 0 : i32
    %c0_i32_0 = arith.constant 0 : i32
    %c0_i32_1 = arith.constant 0 : i32
    return %arg0, %c0_i32, %c0_i32_0 : i32, i32, i32
  }
}

</mosaic_0001>

<bundles_post_ra>
// kernel: tpu_custom_call.1
= control target key start
LH: loop header
LB: loop body
LE: loop exit
PB: predicated region body
PF: predicated region fallthrough
CT: control target
= control target key end

     0   :  { %s1382_s0 = inlined_call_operand.hbm [shape: bf16[48,128], index: 0, kind: input, shape index: {}]   ;;  %s1383_s1 = inlined_call_operand.hbm [shape: bf16[128,128], index: 1, kind: input, shape index: {}]   ;;  %s1384_s2 = inlined_call_operand.vmem [shape: f32[1,128], index: 2, kind: input, shape index: {}]   ;;  %s1385_s3 = inlined_call_operand.vmem [shape: f32[1,128], index: 3, kind: input, shape index: {}]   ;;  %s1386_s4 = inlined_call_operand.<no memory space> [shape: f32[1], index: 4, kind: input, shape index: {}]   ;;  %s1387_s5 = inlined_call_operand.hbm [shape: f32[3,1,16], index: 5, kind: output, shape index: {}]  }
   0x1   :  { %10 = sst [smem:[#allocation3]] %s1386_s4 }
   0x2   :  { %11 = vsyncpa [#allocation5], 0 }
   0x3   :  { %13 = vsyncpa [#allocation5 + $0x1], 0 }
   0x4   :  { %14 = vsyncpa [#allocation8], 0 }
   0x5   :  { %15 = vsyncpa [#allocation6], 0 }
   0x6   :  { %17 = vsyncpa [#allocation6 + $0x1], 0  ;;  %s1125_s20 = smov 0   ;;  %s1127_s21 = smov 0  }
   0x7   :  { %s1129_s22 = smov 0   ;;  %s1131_s23 = smov 0  }
   0x8   :  { %s1133_s24 = smov 0   ;;  %s1135_s25 = smov 0  }
   0x9 LB: > { %s786_s4 = sadd.s32 4294967295, %s1081_s25   ;;  %s787_s26 = sadd.s32 4294967294, %s1081_s25   ;;  %s1081_s25 = sphi %s1135_s25, %s23_s25   ;;  %s1077_s24 = sphi %s1133_s24, %s1410_s24   ;;  %s1073_s23 = sphi %s1131_s23, %s1409_s23   ;;  %s1069_s22 = sphi %s1129_s22, %s1408_s22   ;;  %s1065_s21 = sphi %s1127_s21, %s1407_s21   ;;  %s1061_s20 = sphi %s1125_s20, %s1406_s20  }
   0xa   : > { %p55_p0 = scmp.ne.s32.totalorder %s1065_s21, %s1061_s20  ;;  %p1159_p1 = scmp.eq.s32.totalorder %s786_s4, 0 }
   0xb   : > { %p1163_p2 = scmp.eq.s32.totalorder %s786_s4, 2  ;;  %p184_p3 = scmp.eq.s32.totalorder %s787_s26, 2 }
   0xc   : > { %s1392_s27 = scalar_select %p1159_p1, 1, 0 }
   0xd   : > { %s1393_s28 = scalar_select %p1163_p2, 1, 0 }
   0xe   : > { %p1169_p4 = por %p1159_p1, %p55_p0  ;;  %p788_p5 = scmp.ge.s32.totalorder %s1081_s25, 1 }
   0xf   : > { %p1174_p6 = por %p184_p3, %p55_p0  ;;  %p191_p7 = scmp.lt.s32.totalorder %s1081_s25, 4 }
  0x10   : > { %s1394_s29 = scalar_select %p1169_p4, 1, 0 }
  0x11   : > { %s1395_s30 = scalar_select %p1174_p6, 1, 0 }
  0x12   : > { %p1179_p8 = pnand %p788_p5, %p191_p7  ;;  %s1083_s7 = smov [#allocation7]  }
  0x13   : > { %s205_s8 = sshll.u32 %s1083_s7, 4  ;;  %s35_s10 = sadd.s32 1, %s1077_s24  ;;  %s206_s8 = int_to_ptr.vmem [resolvable:$true] %s205_s8 }
  0x14   : > { %s1396_s6 = scalar_select %p1179_p8, 1, 0 }
  0x15   : > { %p851_p9 = pneg %p1179_p8  ;;  %s937_s13 = scalar_lea.hbm %s1383_s1, 1024 }
  0x16   : > { %p938_p11 = scmp.ne.s32.totalorder %s1383_s1, %s937_s13  ;;  %p944_p3 = scmp.lt.u32.totalorder %s937_s13, %s1383_s1 }
  0x17   : > { %p1187_p10 = pnand %p851_p9, %p1159_p1 }
  0x19   : > { %p939_p12 = pneg %p1187_p10 }
  0x1b   : > { %p940_p13 = pnand %p939_p12, %p938_p11 }
  0x1d   : > { %p941_p0 = pneg %p940_p13 }
  0x1f   : > { %p946_p5 = pnand %p944_p3, %p941_p0 }
  0x21   : > { %949 = shalt.err (!%p946_p5)
}
  0x22   : > { %s950_s18 = scalar_lea.vmem %s206_s8, 1024  ;;  %p958_p1 = scmp.lt.s32.totalorder %s206_s8, %s206_s8 }
  0x23   : > { %p951_p7 = scmp.ne.s32.totalorder %s206_s8, %s950_s18  ;;  %p959_p4 = scmp.lt.s32.totalorder %s950_s18, %s950_s18 }
  0x25   : > { %p953_p9 = pnand %p951_p7, %p939_p12  ;;  %p960_p8 = por %p959_p4, %p958_p1 }
  0x27   : > { %p954_p6 = pneg %p953_p9 }
  0x29   : > { %p961_p2 = pnand %p960_p8, %p954_p6 }
  0x2b   : > { %964 = shalt.err (!%p961_p2)
}
  0x2c   : > { %s1084_s19 = smov 64   ;;  %s1085_s4 = smov 4  }
  0x2d   : > { %854 = dma.hbm_to_vmem [thread:$0]  (!%p1187_p10), %s1383_s1, 1024, %s206_s8, [#allocation8], %s1084_s19, %s1084_s19, %s1085_s4  }
  0x2e   : > { %p37_p1 = scmp.ge.s32.totalorder %s35_s10, 3  ;;  %s42_s11 = sadd.s32 1, %s1069_s22 }
  0x2f   : > { %p49_p2 = scmp.ne.s32.totalorder %s1069_s22, %s1065_s21  ;;  %p50_p4 = scmp.eq.s32.totalorder %s1081_s25, 0 }
  0x30   : > { %s1412_s10 = smov (%p37_p1, %s35_s10), 0  ;;  %p1399_p8 = scmp.ne.s32.totalorder %s1393_s28, 0 }
  0x31   : > { %p1217_p6 = por %p50_p4, %p49_p2  ;;  %s39_s13 = ssub.s32 %s1077_s24, %s1412_s10 }
  0x32   : > { %p1223_p11 = por %p1399_p8, %p49_p2  ;;  %p864_p12 = scmp.lt.s32.totalorder %s1081_s25, 3 }
  0x33   : > { %p40_p10 = scmp.eq.s32.totalorder %s39_s13, 0  ;;  %s234_s8 = sand.u32 1, %s1069_s22  }
  0x34   : > { %s793_s14 = sshll.u32 %s234_s8, 3  ;;  %s813_s16 = sshll.u32 %s1077_s24, 7 }
  0x35   : > { %s1232_s15 = scalar_select %p40_p10, %s1069_s22, %s42_s11  }
  0x36   : > { %s1238_s26 = scalar_lea.hbm %s1382_s0, %s813_s16  ;;  %s238_s28 = scalar_lea.vmem [#allocation4], %s793_s14 }
  0x37   : > { %s245_s7 = sshll.u32 %s238_s28, 4  ;;  %p1244_p13 = pnand %p864_p12, %p1217_p6  ;;  %s1240_s7 = int_to_ptr.vmem [resolvable:$true] %s245_s7 }
  0x38   : > { %s1248_s11 = scalar_lea.sflag [#allocation5], %s234_s8  ;;  %s965_s17 = scalar_lea.hbm %s1238_s26, 128 }
  0x39   : > { %p966_p0 = scmp.ne.s32.totalorder %s1238_s26, %s965_s17  ;;  %p967_p3 = pneg %p1244_p13 }
  0x3a   : > { %s970_s12 = scalar_lea.hbm %s1382_s0, 384  ;;  %p971_p9 = scmp.lt.u32.totalorder %s1238_s26, %s1382_s0 }
  0x3b   : > { %p968_p5 = pnand %p967_p3, %p966_p0  ;;  %p972_p1 = scmp.lt.u32.totalorder %s970_s12, %s965_s17 }
  0x3c   : > { %p974_p4 = scmp.lt.u32.totalorder %s965_s17, %s1238_s26 }
  0x3d   : > { %p969_p7 = pneg %p968_p5  ;;  %p973_p2 = por %p972_p1, %p971_p9 }
  0x3f   : > { %p975_p6 = por %p974_p4, %p973_p2 }
  0x41   : > { %p976_p8 = pnand %p975_p6, %p969_p7 }
  0x43   : > { %979 = shalt.err (!%p976_p8)
}
  0x44   : > { %s980_s8 = scalar_lea.vmem %s1240_s7, 128  ;;  %s1086_s14 = smov [#allocation4]  }
  0x45   : > { %p981_p12 = scmp.ne.s32.totalorder %s1240_s7, %s980_s8  ;;  %s985_s16 = sshll.u32 %s1086_s14, 4  ;;  %s986_s16 = int_to_ptr.vmem [resolvable:$false] %s985_s16 }
  0x46   : > { %s987_s18 = scalar_lea.vmem %s986_s16, 256  ;;  %p988_p5 = scmp.lt.s32.totalorder %s1240_s7, %s986_s16 }
  0x47   : > { %p983_p10 = pnand %p981_p12, %p967_p3  ;;  %p989_p9 = scmp.lt.s32.totalorder %s987_s18, %s980_s8 }
  0x49   : > { %p984_p0 = pneg %p983_p10  ;;  %p990_p1 = por %p989_p9, %p988_p5 }
  0x4b   : > { %p991_p2 = pnand %p990_p1, %p984_p0 }
  0x4d   : > { %994 = shalt.err (!%p991_p2)
}
  0x4e   : > { %858 = dma.hbm_to_vmem [thread:$0]  (!%p1244_p13), %s1238_s26, 128, %s1240_s7, %s1248_s11, %s1084_s19, %s1084_s19, %s1085_s4  }
  0x4f   : > { %p1402_p3 = scmp.ne.s32.totalorder %s1396_s6, 0 }
  0x50   : > { %s1282_s17 = sand.u32 (!%p1402_p3), 1, %s1065_s21   ;;  %p1403_p7 = scmp.ne.s32.totalorder (!%p1402_p3), %s1394_s29, 0 }
  0x51   : > { %257 = sbr.rel (%p1402_p3) target bundleno = 693 (0x2b5), region = 40  ;;  %s797_s12 = sshll.u32 (!%p1402_p3), %s1282_s17, 3 }
  0x52   : > { %s260_s28 = scalar_lea.sflag (!%p1402_p3), [#allocation5], %s1282_s17  ;;  %s1286_s8 = scalar_lea.vmem (!%p1402_p3), [#allocation4], %s797_s12 }
  0x58   : > { %1048 = dma.done.wait (%p1403_p7), %s260_s28, 128  }
  0x59   : > { %1050 = vsyncadd (%p1403_p7), %s260_s28, 4294967168  ;;  %p1404_p13 = scmp.ne.s32.totalorder %s1392_s27, 0 }
  0x5b   : > { %1052 = dma.done.wait (%p1404_p13), [#allocation8], 1024  }
  0x5c   : > { %1054 = vsyncadd (%p1404_p13), [#allocation8], 4294966272  ;;  %v1087_v0 = vmov 0.0   ;;  %vm1088_vm0 = vmmov 0   ;;  %v924_v1 = vld [vmem:[#allocation7] sm:$0xff]   ;;  %v925_v2 = vld [vmem:[#allocation7 + $0x8] sm:$0xff]   ;;  %v451_v23 = vlaneseq }
  0x5d   : > { %823 = vmatprep.subr.bf16.mxu0 %v1087_v0  ;;  %839 = vmatprep.mubr.msk.bf16.mxu0 %vm1088_vm0, %v1087_v0  ;;  %v926_v3 = vld [vmem:[#allocation7 + $0x10] sm:$0xff]   ;;  %v927_v4 = vld [vmem:[#allocation7 + $0x18] sm:$0xff]   ;;  %v928_v5 = vld [vmem:[#allocation7 + $0x20] sm:$0xff]   ;;  %v1089_v22 = vmov 0   ;;  %v1090_v24 = vmov 1966171168  }
  0x5e   : > { %824 = vmatpush3.bf16.msra.mxu0 %v924_v1  ;;  %v929_v6 = vld [vmem:[#allocation7 + $0x28] sm:$0xff]   ;;  %v930_v7 = vld [vmem:[#allocation7 + $0x30] sm:$0xff]   ;;  %v931_v8 = vld [vmem:[#allocation7 + $0x38] sm:$0xff]   ;;  %922 = vset.pattern.permute.xlu1 %v1089_v22  ;;  %v520_v25 = vunpack.c.l.s4 %v1090_v24  ;;  %v1312_v26 = vshrl.u32 %v451_v23, 7  ;;  %vm311_vm1 = vcmask 122880   ;;  %vm630_vm2 = vcmask 130112  }
  0x5f   : > { %825 = vmatprep.subr.bf16.mxu0 %v1087_v0  ;;  %v932_v9 = vld [vmem:[%s1286_s8] sm:$0xff]   ;;  %v799_v10 = vld [vmem:[%s1384_s2] ss:$0 sm:$0xff]  ;;  %923 = vset.pattern.permute.xlu0 %v1089_v22  ;;  %312 = vst.msk [vmem:[#allocation2] sm:$0x1] %vm311_vm1, %v1087_v0  ;;  %s654_s4 = sld [smem:[#allocation3]] }
  0x60   : > { %v809_v15 = vld [vmem:[%s1385_s3] ss:$0 sm:$0xff]  ;;  %v521_v27 = vunpack.c.0.s8 %v520_v25  ;;  %v453_v28 = vsub.s32 0, %v1312_v26  ;;  %v457_v29 = vsub.s32 1, %v1312_v26  ;;  %v461_v30 = vsub.s32 2, %v1312_v26  ;;  %s810_s26 = sshll.u32 %s1073_s23, 4 }
  0x61   : > { %v465_v31 = vsub.s32 3, %v1312_v26  ;;  %v469_v32 = vsub.s32 4, %v1312_v26  ;;  %v473_v33 = vsub.s32 5, %v1312_v26  ;;  %v477_v34 = vsub.s32 6, %v1312_v26  ;;  %s298_s7 = scalar_lea.vmem [#allocation9], %s1282_s17  ;;  %s1333_s16 = scalar_lea.hbm %s1387_s5, %s810_s26 }
  0x62   : > { %826 = vmatpush3.bf16.msra.mxu0 %v925_v2  ;;  %v481_v35 = vsub.s32 7, %v1312_v26  ;;  %v524_v37 = vsub.s32 %v521_v27, %v1312_v26  ;;  %s676_s13 = sshll.u32 %s298_s7, 4  ;;  %s664_s18 = scalar_lea.sflag [#allocation6], %s1282_s17  ;;  %s1335_s13 = int_to_ptr.vmem [resolvable:$true] %s676_s13 }
  0x63   : > { %827 = vmatprep.subr.bf16.mxu0 %v1087_v0  ;;  %s995_s12 = scalar_lea.vmem %s1335_s13, 16  ;;  %s1091_s23 = smov [#allocation9]  }
  0x64   : > { %p996_p4 = scmp.ne.s32.totalorder %s1335_s13, %s995_s12  ;;  %s999_s28 = sshll.u32 %s1091_s23, 4  ;;  %s1000_s28 = int_to_ptr.vmem [resolvable:$false] %s999_s28 }
  0x65   : > { %s1001_s8 = scalar_lea.vmem %s1000_s28, 32  ;;  %p1002_p12 = scmp.lt.s32.totalorder %s1335_s13, %s1000_s28 }
  0x66   : > { %828 = vmatpush3.bf16.msra.mxu0 %v926_v3  ;;  %p997_p6 = pnand %p996_p4, %p1223_p11  ;;  %p1003_p10 = scmp.lt.s32.totalorder %s1001_s8, %s995_s12 }
  0x67   : > { %829 = vmatprep.subr.bf16.mxu0 %v1087_v0 }
  0x68   : > { %p998_p8 = pneg %p997_p6  ;;  %p1004_p0 = por %p1003_p10, %p1002_p12 }
  0x6a   : > { %830 = vmatpush3.bf16.msra.mxu0 %v927_v4  ;;  %p1005_p5 = pnand %p1004_p0, %p998_p8 }
  0x6b   : > { %831 = vmatprep.subr.bf16.mxu0 %v1087_v0 }
  0x6e   : > { %832 = vmatpush3.bf16.msra.mxu0 %v928_v5 }
  0x6f   : > { %833 = vmatprep.subr.bf16.mxu0 %v1087_v0 }
  0x72   : > { %834 = vmatpush3.bf16.msra.mxu0 %v929_v6 }
  0x73   : > { %835 = vmatprep.subr.bf16.mxu0 %v1087_v0 }
  0x76   : > { %836 = vmatpush3.bf16.msra.mxu0 %v930_v7 }
  0x77   : > { %837 = vmatprep.subr.bf16.mxu0 %v1087_v0 }
  0x7a   : > { %838 = vmatpush3.bf16.msra.mxu0 %v931_v8 }
  0x7d   : > { %840 = vmatmul.mubr.bf16.vlgmr.msra.gmra.mrb[0].mxu0 %v932_v9 }
 0x150   : > { %v427_v11 = vpop.f32.mrb[0].mxu0 }
 0x151   : > { %v428_v12 = vadd.f32 %v799_v10, %v427_v11  ;;  %v841_v13 = vpop.f32.mrb[1].mxu0 }
 0x152   : > { %v430_v14 = vpop.f32.mrb[2].mxu0 }
 0x153   : > { %v434_v16 = vmax.f32 %v428_v12, 0.0  ;;  %v431_v17 = vadd.f32 %v799_v10, %v430_v14  ;;  %v842_v18 = vpop.f32.mrb[3].mxu0 }
 0x154   : > { %v620_v18 = vand.u32 127, %v451_v23  ;;  %v655_v23 = vstv %s654_s4 }
 0x155   : > { %v435_v19 = vmax.f32 %v431_v17, 0.0  ;;  %v442_v20 = vmul.f32 %v809_v15, %v434_v16 }
 0x157   : > { %444 = vadd.xlane.f32.xlu0 %v442_v20  ;;  %v443_v21 = vmul.f32 %v809_v15, %v435_v19  ;;  %v625_v19 = vadd.s32 4294967288, %v620_v18 }
 0x159   : > { %v628_v22 = vsub.s32 %v625_v19, %v1312_v26 }
 0x15b   : > { %446 = vadd.xlane.f32.xlu0 %v443_v21  ;;  %v623_v21 = vsub.s32 %v620_v18, %v1312_v26 }
 0x1e4   : > { %v445_v36 = vpop.xlane.xlu0 %444 }
 0x1e5   : > { %v454_v38 = vrot.slane %v445_v36, %v453_v28  ;;  %v458_v39 = vrot.slane %v445_v36, %v457_v29  ;;  %v462_v40 = vrot.slane %v445_v36, %v461_v30  ;;  %v466_v41 = vrot.slane %v445_v36, %v465_v31 }
 0x1e6   : > { %v470_v42 = vrot.slane %v445_v36, %v469_v32  ;;  %v474_v43 = vrot.slane %v445_v36, %v473_v33  ;;  %v478_v44 = vrot.slane %v445_v36, %v477_v34  ;;  %v482_v45 = vrot.slane %v445_v36, %v481_v35 }
 0x1e7   : > { %v515_v46 = vcombine.low %v454_v38, %v458_v39  ;;  %v516_v47 = vcombine.low %v462_v40, %v466_v41 }
 0x1e8   : > { %v447_v48 = vpop.xlane.xlu0 %446  ;;  %v517_v49 = vcombine.low %v470_v42, %v474_v43  ;;  %v518_v50 = vcombine.low %v478_v44, %v482_v45 }
 0x1e9   : > { %v525_v51 = vrot.slane %v515_v46, %v524_v37  ;;  %v532_v52 = vrot.slane %v516_v47, %v524_v37  ;;  %v486_v53 = vrot.slane %v447_v48, %v453_v28  ;;  %v490_v54 = vrot.slane %v447_v48, %v457_v29 }
 0x1ea   : > { %v539_v55 = vrot.slane %v517_v49, %v524_v37  ;;  %v546_v56 = vrot.slane %v518_v50, %v524_v37  ;;  %v494_v57 = vrot.slane %v447_v48, %v461_v30  ;;  %v498_v58 = vrot.slane %v447_v48, %v465_v31  ;;  %v448_v30 = vld [vmem:[#allocation2] sm:$0x1] }
 0x1eb   : > { %v547_v59 = vcombine.low %v525_v51, %v532_v52  ;;  %v502_v60 = vrot.slane %v447_v48, %v469_v32  ;;  %v506_v61 = vrot.slane %v447_v48, %v473_v33  ;;  %v510_v62 = vrot.slane %v447_v48, %v477_v34 }
 0x1ec   : > { %v548_v63 = vcombine.low %v539_v55, %v546_v56  ;;  %v514_v1 = vrot.slane %v447_v48, %v481_v35  ;;  %v564_v2 = vcombine.low %v486_v53, %v490_v54  ;;  %v565_v3 = vcombine.low %v494_v57, %v498_v58 }
 0x1ed   : > { %v555_v4 = vrot.slane %v547_v59, %v524_v37  ;;  %v566_v5 = vcombine.low %v502_v60, %v506_v61 }
 0x1ee   : > { %v562_v6 = vrot.slane %v548_v63, %v524_v37  ;;  %v567_v7 = vcombine.low %v510_v62, %v514_v1  ;;  %v574_v8 = vrot.slane %v564_v2, %v524_v37  ;;  %v581_v9 = vrot.slane %v565_v3, %v524_v37 }
 0x1ef   : > { %v588_v10 = vrot.slane %v566_v5, %v524_v37 }
 0x1f0   : > { %v563_v11 = vcombine.low %v555_v4, %v562_v6  ;;  %v595_v12 = vrot.slane %v567_v7, %v524_v37  ;;  %v596_v13 = vcombine.low %v574_v8, %v581_v9 }
 0x1f2   : > { %614 = vperm.xlu1 %922, %v563_v11   ;;  %v597_v14 = vcombine.low %v588_v10, %v595_v12  ;;  %v604_v15 = vrot.slane %v596_v13, %v524_v37 }
 0x1f4   : > { %v611_v16 = vrot.slane %v597_v14, %v524_v37 }
 0x1f6   : > { %v612_v17 = vcombine.low %v604_v15, %v611_v16 }
 0x1f8   : > { %617 = vperm.xlu1 %922, %v612_v17  }
 0x271   : > { %v615_v20 = vpop.permute.xlu1 %614 }
 0x272   : > { %v624_v25 = vrot.slane %v615_v20, %v623_v21 }
 0x277   : > { %v618_v24 = vpop.permute.xlu1 %617 }
 0x278   : > { %v629_v27 = vrot.slane %v618_v24, %v628_v22 }
 0x27a   : > { %v631_v28 = vsel %vm630_vm2, %v629_v27, %v624_v25 }
 0x27b   : > { %v638_v29 = vrot.slane %v631_v28, %v524_v37 }
 0x27d   : > { %v645_v31 = vrot.slane %v638_v29, %v524_v37 }
 0x27f   : > { %v647_v0 = vadd.f32 %v645_v31, %v448_v30 }
 0x281   : > { %649 = vst.msk [vmem:[#allocation2] sm:$0x1] %vm311_vm1, %v647_v0 }
 0x288   : > { %v653_v32 = vld [vmem:[#allocation2] sm:$0x1] }
 0x289   : > { %v656_v33 = vadd.f32 %v655_v23, %v653_v32 }
 0x28b   : > { %v657_v34 = vsub.f32 0.0, %v656_v33 }
 0x28d   : > { %v658_v26 = vmul.f32 1.442695, %v657_v34 }
 0x28f   : > { %933 = vpow2.f32 %v658_v26 }
 0x299   : > { %v934_v35 = vpop.eup %933 }
 0x29a   : > { %v660_v36 = vadd.f32 1.0, %v934_v35 }
 0x29c   : > { %935 = vrcp.f32 %v660_v36 }
 0x2a6   : > { %v936_v37 = vpop.eup %935 }
 0x2a7   : > { %662 = vst.msk [vmem:[%s298_s7] sm:$0x1] %vm311_vm1, %v936_v37 }
 0x2a8   : > { %1008 = shalt.err (!%p1005_p5)
}
 0x2a9   : > { %s1009_s17 = scalar_lea.hbm %s1333_s16, 16  ;;  %s1013_s6 = scalar_lea.hbm %s1387_s5, 48 }
 0x2aa   : > { %p1010_p9 = scmp.ne.s32.totalorder %s1333_s16, %s1009_s17  ;;  %p1014_p3 = scmp.lt.u32.totalorder %s1333_s16, %s1387_s5 }
 0x2ab   : > { %p1015_p7 = scmp.lt.u32.totalorder %s1013_s6, %s1009_s17  ;;  %p1017_p4 = scmp.lt.u32.totalorder %s1009_s17, %s1333_s16 }
 0x2ac   : > { %p1011_p1 = pnand %p1010_p9, %p1223_p11 }
 0x2ad   : > { %p1016_p13 = por %p1015_p7, %p1014_p3 }
 0x2ae   : > { %p1012_p2 = pneg %p1011_p1 }
 0x2af   : > { %p1018_p6 = por %p1017_p4, %p1016_p13 }
 0x2b1   : > { %p1019_p8 = pnand %p1018_p6, %p1012_p2 }
 0x2b3   : > { %1022 = shalt.err (!%p1019_p8)
}
 0x2b4   : > { %849 = dma.vmem_to_hbm [thread:$0]  (%p1223_p11), %s1335_s13, 16, %s1333_s16, %s664_s18  }
 0x2b5 PF: > { %p866_p12 = scmp.ge.s32.totalorder %s1081_s25, 2  ;;  %s688_s26 = sand.u32 1, %s1061_s20  }
 0x2b6   : > { %p1405_p10 = scmp.ne.s32.totalorder %s1395_s30, 0  ;;  %s689_s7 = scalar_lea.sflag [#allocation6], %s688_s26 }
 0x2b8   : > { %p860_p0 = pnand %p866_p12, %p1405_p10 }
 0x2ba   : > { %1056 = dma.done.wait (!%p860_p0), %s689_s7, 16  }
 0x2bb   : > { %1058 = vsyncadd (!%p860_p0), %s689_s7, 4294967280  ;;  %s23_s25 = sadd.s32 1, %s1081_s25   ;;  %s1406_s20 = smov %s1065_s21 }
 0x2bc   : > { %p20_p5 = scmp.ge.s32.totalorder %s23_s25, 5   ;;  %s1407_s21 = smov %s1069_s22 }
 0x2bd   : > { %s1408_s22 = smov %s1232_s15  ;;  %s1409_s23 = smov %s1077_s24 }
 0x2be   : > { %s1410_s24 = smov %s1412_s10  ;;  %22 = sbr.rel (!%p20_p5) target bundleno = 9 (0x9), region = 104 }
 0x2c5   :  { %693 = vsyncpa [#allocation5], 1 }
 0x2c6   :  { %695 = vsyncpa [#allocation5 + $0x1], 1 }
 0x2c7   :  { %696 = vsyncpa [#allocation8], 1 }
 0x2c8   :  { %697 = vsyncpa [#allocation6], 1 }
 0x2c9   :  { %699 = vsyncpa [#allocation6 + $0x1], 1 }

</bundles_post_ra>
